<compile_context>
chip_gen: v7x
topology: tpu7x:2x2x1
jax: 0.10.0
libtpu: 0.0.40
codegen_flags: <defaults>
</compile_context>

<pallas_src>
import functools

import jax
import jax.numpy as jnp
from jax.experimental import pallas as pl
from jax.experimental.pallas import tpu as pltpu

N_ACTIONS = 20
N_STATES = 57
H1 = 128
H2 = 64

K_PAD = 64            # N_STATES padded to an MXU-friendly K (zero rows in w1)
OUT_PAD = 128         # layer-3 MXU width (zero cols in w3); only 20 are stored
DEFAULT_BLOCK_B = 4096  # batch-tile cap; ~16 MiB VMEM footprint -> safe everywhere
_MIN_ROWS_PER_SPLIT = 2048  # force >=2 grid steps (v7x 2 TCs) once B >= 2x this


def _round_up(x, m):
    return (x + m - 1) // m * m


def _choose_tile(B, block_b):
    """Balanced batch tile: multiple of 16 rows, capped at block_b, and split
    into >=2 tiles for large batches so both v7x TensorCores get work."""
    block_b = max(16, _round_up(block_b, 16))
    n_tiles = pl.cdiv(B, block_b)
    if n_tiles == 1 and B >= 2 * _MIN_ROWS_PER_SPLIT:
        n_tiles = 2
    return min(_round_up(pl.cdiv(B, n_tiles), 16), block_b)


def _mlp_kernel(x_ref, w1_ref, b1_ref, w2_ref, b2_ref, w3_ref, b3_ref, o_ref,
                xpad_ref):
    # Fused 3-layer MLP: three MXU matmuls (bf16 in, f32 accumulate) with VPU
    # ReLU + bias adds in between. Everything for one batch tile lives in VMEM.

    # Fuse f32->bf16 cast + K pad (57 -> 64) here via a VMEM staging buffer:
    # two masked lane stores, zero extra HBM traffic, no wrapper pad pass.
    xpad_ref[:, N_STATES:] = jnp.zeros(
        (xpad_ref.shape[0], K_PAD - N_STATES), xpad_ref.dtype)
    xpad_ref[:, :N_STATES] = x_ref[...].astype(jnp.bfloat16)
    x = xpad_ref[...]                                             # (TB, 64) bf16

    h1 = jnp.dot(x, w1_ref[...], preferred_element_type=jnp.float32)
    h1 = jnp.maximum(h1 + b1_ref[...], 0.0).astype(jnp.bfloat16)  # (TB, 128)

    h2 = jnp.dot(h1, w2_ref[...], preferred_element_type=jnp.float32)
    h2 = jnp.maximum(h2 + b2_ref[...], 0.0).astype(jnp.bfloat16)  # (TB, 64)

    h3 = jnp.dot(h2, w3_ref[...], preferred_element_type=jnp.float32)
    h3 = h3 + b3_ref[...]                                         # (TB, 128) f32
    # Narrow output stream: store only the 20 real action columns.
    o_ref[...] = h3[:, :N_ACTIONS].astype(o_ref.dtype)


def prepare_params(params):
    """One-time prep: transpose (out,in)->(in,out), zero-pad to padded dims,
    cast weights to bf16, biases to (1, out) f32. Call once, not per forward."""
    w1 = jnp.zeros((K_PAD, H1), jnp.bfloat16).at[:N_STATES, :].set(
        params["w1"].T.astype(jnp.bfloat16))
    w2 = params["w2"].T.astype(jnp.bfloat16)                       # (128, 64)
    w3 = jnp.zeros((H2, OUT_PAD), jnp.bfloat16).at[:, :N_ACTIONS].set(
        params["w3"].T.astype(jnp.bfloat16))
    b1 = params["b1"].reshape(1, H1).astype(jnp.float32)
    b2 = params["b2"].reshape(1, H2).astype(jnp.float32)
    b3 = jnp.zeros((1, OUT_PAD), jnp.float32).at[:, :N_ACTIONS].set(
        params["b3"].reshape(1, N_ACTIONS).astype(jnp.float32))
    return {"w1": w1, "b1": b1, "w2": w2, "b2": b2, "w3": w3, "b3": b3}


@functools.partial(jax.jit, static_argnames=("block_b",))
def net_forward(x, prepped, block_b=DEFAULT_BLOCK_B):
    """x: (B, N_STATES) float32. prepped: output of prepare_params.
    Returns (B, N_ACTIONS) float32."""
    B = x.shape[0]
    tb = _choose_tile(B, block_b)
    b_pad = _round_up(B, tb)
    grid = (b_pad // tb,)

    # Only row-pad when needed (static shapes -> branch resolved at trace time).
    # No feature-dim pad / cast here: that is fused into the kernel.
    x_in = x if b_pad == B else jnp.pad(x, ((0, b_pad - B), (0, 0)))

    flops = 2 * b_pad * (K_PAD * H1 + H1 * H2 + H2 * OUT_PAD)
    bytes_accessed = (
        b_pad * N_STATES * 4                                 # x stream (f32)
        + (K_PAD * H1 + H1 * H2 + H2 * OUT_PAD) * 2          # weights (bf16)
        + (H1 + H2 + OUT_PAD) * 4                            # biases (f32)
        + b_pad * N_ACTIONS * 4)                             # output (f32, 20 lanes)

    # Weights/biases: constant block index -> fetched once, VMEM-resident.
    resident = lambda shape: pl.BlockSpec(shape, lambda i: (0,) * len(shape))

    out = pl.pallas_call(
        _mlp_kernel,
        out_shape=jax.ShapeDtypeStruct((b_pad, N_ACTIONS), jnp.float32),
        grid=grid,
        in_specs=[
            pl.BlockSpec((tb, N_STATES), lambda i: (i, 0)),  # x: batch-tiled f32
            resident((K_PAD, H1)),
            resident((1, H1)),
            resident((H1, H2)),
            resident((1, H2)),
            resident((H2, OUT_PAD)),
            resident((1, OUT_PAD)),
        ],
        out_specs=pl.BlockSpec((tb, N_ACTIONS), lambda i: (i, 0)),
        scratch_shapes=[pltpu.VMEM((tb, K_PAD), jnp.bfloat16)],  # K-pad staging
        compiler_params=pltpu.CompilerParams(
            dimension_semantics=("parallel",)),
        cost_estimate=pl.CostEstimate(
            flops=flops, transcendentals=0, bytes_accessed=bytes_accessed),
    )(x_in, prepped["w1"], prepped["b1"], prepped["w2"], prepped["b2"],
      prepped["w3"], prepped["b3"])

    return out if b_pad == B else out[:B]


def init_params(key):
    """Deterministic init matching nn.Linear shapes (out, in) / (out,)."""
    ks = jax.random.split(key, 6)

    def uniform_linear(kw, kb, fan_in, fan_out):
        # PyTorch default: U(-1/sqrt(fan_in), 1/sqrt(fan_in))
        bound = 1.0 / jnp.sqrt(float(fan_in))
        w = jax.random.uniform(kw, (fan_out, fan_in), jnp.float32, -bound, bound)
        b = jax.random.uniform(kb, (fan_out,), jnp.float32, -bound, bound)
        return w, b

    w1, b1 = uniform_linear(ks[0], ks[1], N_STATES, H1)
    w2, b2 = uniform_linear(ks[2], ks[3], H1, H2)
    w3, b3 = uniform_linear(ks[4], ks[5], H2, N_ACTIONS)
    return {"w1": w1, "b1": b1, "w2": w2, "b2": b2, "w3": w3, "b3": b3}


def net_forward_ref_f32(x, p):
    """Pure-f32 PyTorch-semantics reference."""
    h1 = jnp.maximum(x @ p["w1"].T + p["b1"], 0.0)
    h2 = jnp.maximum(h1 @ p["w2"].T + p["b2"], 0.0)
    return h2 @ p["w3"].T + p["b3"]


def net_forward_ref_bf16(x, p):
    """Reference with the same quantization as the kernel (bf16 in, f32 acc)."""
    w1 = p["w1"].T.astype(jnp.bfloat16)
    w2 = p["w2"].T.astype(jnp.bfloat16)
    w3 = p["w3"].T.astype(jnp.bfloat16)
    h1 = jnp.dot(x.astype(jnp.bfloat16), w1, preferred_element_type=jnp.float32)
    h1 = jnp.maximum(h1 + p["b1"], 0.0)
    h2 = jnp.dot(h1.astype(jnp.bfloat16), w2, preferred_element_type=jnp.float32)
    h2 = jnp.maximum(h2 + p["b2"], 0.0)
    h3 = jnp.dot(h2.astype(jnp.bfloat16), w3, preferred_element_type=jnp.float32)
    return h3 + p["b3"]


if __name__ == "__main__":
    key = jax.random.PRNGKey(0)
    k_param, k_x, k_x2 = jax.random.split(key, 3)

    params = init_params(k_param)
    prepped = prepare_params(params)   # one-time transpose/pad/cast

    # Small deterministic test batch (single 16-row tile, row padding path).
    B = 8
    x = jax.random.normal(k_x, (B, N_STATES), jnp.float32)

    out = jax.block_until_ready(net_forward(x, prepped))
    assert out.shape == (B, N_ACTIONS), out.shape

    ref_q = net_forward_ref_bf16(x, params)
    assert jnp.allclose(out, ref_q, atol=2e-3, rtol=2e-3), "mismatch vs bf16 reference"

    ref_f32 = net_forward_ref_f32(x, params)
    assert jnp.allclose(out, ref_f32, atol=5e-2, rtol=5e-2), "mismatch vs f32 reference"

    # Exercise the multi-tile batch grid + balanced tiling (2 tiles of 16 rows).
    B2 = 30
    x2 = jax.random.normal(k_x2, (B2, N_STATES), jnp.float32)
    out2 = jax.block_until_ready(net_forward(x2, prepped, block_b=16))
    assert out2.shape == (B2, N_ACTIONS), out2.shape
    ref2 = net_forward_ref_bf16(x2, params)
    assert jnp.allclose(out2, ref2, atol=2e-3, rtol=2e-3), "mismatch on tiled batch"

    print("KERNEL_OK")
</pallas_src>

<mosaic_0001>
module attributes {stable_mosaic.version = 11 : i64} {
  func.func @_mlp_kernel(%arg0: i32, %arg1: memref<16x57xf32, #tpu.memory_space<vmem>>, %arg2: memref<64x128xbf16, #tpu.memory_space<vmem>>, %arg3: memref<1x128xf32, #tpu.memory_space<vmem>>, %arg4: memref<128x64xbf16, #tpu.memory_space<vmem>>, %arg5: memref<1x64xf32, #tpu.memory_space<vmem>>, %arg6: memref<64x128xbf16, #tpu.memory_space<vmem>>, %arg7: memref<1x128xf32, #tpu.memory_space<vmem>>, %arg8: memref<16x20xf32, #tpu.memory_space<vmem>>, %arg9: memref<16x64xbf16, #tpu.memory_space<vmem>>) attributes {dimension_semantics = [#tpu.dimension_semantics<parallel>], iteration_bounds = array<i64: 1>, scalar_prefetch = 0 : i64, scratch_operands = 1 : i64, tpu.core_type = #tpu.core_type<tc>, window_params = [{transform_indices = @transform_0, window_bounds = array<i64: 16, 57>}, {pipeline_mode = #tpu.pipeline_mode<synchronous>, transform_indices = @transform_1, window_bounds = array<i64: 64, 128>}, {pipeline_mode = #tpu.pipeline_mode<synchronous>, transform_indices = @transform_2, window_bounds = array<i64: 1, 128>}, {pipeline_mode = #tpu.pipeline_mode<synchronous>, transform_indices = @transform_3, window_bounds = array<i64: 128, 64>}, {pipeline_mode = #tpu.pipeline_mode<synchronous>, transform_indices = @transform_4, window_bounds = array<i64: 1, 64>}, {pipeline_mode = #tpu.pipeline_mode<synchronous>, transform_indices = @transform_5, window_bounds = array<i64: 64, 128>}, {pipeline_mode = #tpu.pipeline_mode<synchronous>, transform_indices = @transform_6, window_bounds = array<i64: 1, 128>}, {transform_indices = @transform_7, window_bounds = array<i64: 16, 20>}]} {
    %cst = arith.constant 0.000000e+00 : bf16
    %0 = vector.broadcast %cst : bf16 to vector<16x7xbf16>
    %c0 = arith.constant 0 : index
    %c57 = arith.constant 57 : index
    %1 = vector.load %arg9[%c0, %c57] : memref<16x64xbf16, #tpu.memory_space<vmem>>, vector<16x7xbf16>
    tpu.vector_store %arg9[%c0, %c57], %0 {strides = array<i32>} : memref<16x64xbf16, #tpu.memory_space<vmem>>, vector<16x7xbf16>,
    %c0_0 = arith.constant 0 : index
    %c0_1 = arith.constant 0 : index
    %2 = vector.load %arg1[%c0_0, %c0_1] : memref<16x57xf32, #tpu.memory_space<vmem>>, vector<16x57xf32>
    %3 = arith.truncf %2 : vector<16x57xf32> to vector<16x57xbf16>
    %c0_2 = arith.constant 0 : index
    %c0_3 = arith.constant 0 : index
    %4 = vector.load %arg9[%c0_2, %c0_3] : memref<16x64xbf16, #tpu.memory_space<vmem>>, vector<16x57xbf16>
    tpu.vector_store %arg9[%c0_2, %c0_3], %3 {strides = array<i32>} : memref<16x64xbf16, #tpu.memory_space<vmem>>, vector<16x57xbf16>,
    %c0_4 = arith.constant 0 : index
    %c0_5 = arith.constant 0 : index
    %5 = vector.load %arg9[%c0_4, %c0_5] : memref<16x64xbf16, #tpu.memory_space<vmem>>, vector<16x64xbf16>
    %c0_6 = arith.constant 0 : index
    %c0_7 = arith.constant 0 : index
    %6 = vector.load %arg2[%c0_6, %c0_7] : memref<64x128xbf16, #tpu.memory_space<vmem>>, vector<64x128xbf16>
    %cst_8 = arith.constant dense<0.000000e+00> : vector<16x128xf32>
    %7 = tpu.matmul %5, %6, %cst_8 {dimension_numbers = #tpu.dot_dimension_numbers<[1], [0], [0], [1], [0, 0, 1, 1], [], []>} : vector<16x64xbf16>, vector<64x128xbf16>, vector<16x128xf32> -> vector<16x128xf32>
    %c0_9 = arith.constant 0 : index
    %c0_10 = arith.constant 0 : index
    %8 = vector.load %arg3[%c0_9, %c0_10] : memref<1x128xf32, #tpu.memory_space<vmem>>, vector<1x128xf32>
    %9 = vector.broadcast %8 : vector<1x128xf32> to vector<16x128xf32>
    %10 = arith.addf %7, %9 : vector<16x128xf32>
    %cst_11 = arith.constant 0.000000e+00 : f32
    %11 = vector.broadcast %cst_11 : f32 to vector<16x128xf32>
    %12 = arith.maximumf %10, %11 : vector<16x128xf32>
    %13 = arith.truncf %12 : vector<16x128xf32> to vector<16x128xbf16>
    %c0_12 = arith.constant 0 : index
    %c0_13 = arith.constant 0 : index
    %14 = vector.load %arg4[%c0_12, %c0_13] : memref<128x64xbf16, #tpu.memory_space<vmem>>, vector<128x64xbf16>
    %cst_14 = arith.constant dense<0.000000e+00> : vector<16x64xf32>
    %15 = tpu.matmul %13, %14, %cst_14 {dimension_numbers = #tpu.dot_dimension_numbers<[1], [0], [0], [1], [0, 0, 1, 1], [], []>} : vector<16x128xbf16>, vector<128x64xbf16>, vector<16x64xf32> -> vector<16x64xf32>
    %c0_15 = arith.constant 0 : index
    %c0_16 = arith.constant 0 : index
    %16 = vector.load %arg5[%c0_15, %c0_16] : memref<1x64xf32, #tpu.memory_space<vmem>>, vector<1x64xf32>
    %17 = vector.broadcast %16 : vector<1x64xf32> to vector<16x64xf32>
    %18 = arith.addf %15, %17 : vector<16x64xf32>
    %cst_17 = arith.constant 0.000000e+00 : f32
    %19 = vector.broadcast %cst_17 : f32 to vector<16x64xf32>
    %20 = arith.maximumf %18, %19 : vector<16x64xf32>
    %21 = arith.truncf %20 : vector<16x64xf32> to vector<16x64xbf16>
    %c0_18 = arith.constant 0 : index
    %c0_19 = arith.constant 0 : index
    %22 = vector.load %arg6[%c0_18, %c0_19] : memref<64x128xbf16, #tpu.memory_space<vmem>>, vector<64x128xbf16>
    %cst_20 = arith.constant dense<0.000000e+00> : vector<16x128xf32>
    %23 = tpu.matmul %21, %22, %cst_20 {dimension_numbers = #tpu.dot_dimension_numbers<[1], [0], [0], [1], [0, 0, 1, 1], [], []>} : vector<16x64xbf16>, vector<64x128xbf16>, vector<16x128xf32> -> vector<16x128xf32>
    %c0_21 = arith.constant 0 : index
    %c0_22 = arith.constant 0 : index
    %24 = vector.load %arg7[%c0_21, %c0_22] : memref<1x128xf32, #tpu.memory_space<vmem>>, vector<1x128xf32>
    %25 = vector.broadcast %24 : vector<1x128xf32> to vector<16x128xf32>
    %26 = arith.addf %23, %25 : vector<16x128xf32>
    %27 = vector.extract_strided_slice %26 {offsets = [0, 0], sizes = [16, 20], strides = [1, 1]} : vector<16x128xf32> to vector<16x20xf32>
    %c0_23 = arith.constant 0 : index
    %c0_24 = arith.constant 0 : index
    %28 = vector.load %arg8[%c0_23, %c0_24] : memref<16x20xf32, #tpu.memory_space<vmem>>, vector<16x20xf32>
    tpu.vector_store %arg8[%c0_23, %c0_24], %27 {strides = array<i32>} : memref<16x20xf32, #tpu.memory_space<vmem>>, vector<16x20xf32>,
    return
  }
  func.func @transform_0(%arg0: i32) -> (i32, i32) {
    %c0_i32 = arith.constant 0 : i32
    %c0_i32_0 = arith.constant 0 : i32
    return %arg0, %c0_i32 : i32, i32
  }
  func.func @transform_1(%arg0: i32) -> (i32, i32) {
    %c0_i32 = arith.constant 0 : i32
    %c0_i32_0 = arith.constant 0 : i32
    %c0_i32_1 = arith.constant 0 : i32
    return %c0_i32, %c0_i32_0 : i32, i32
  }
  func.func @transform_2(%arg0: i32) -> (i32, i32) {
    %c0_i32 = arith.constant 0 : i32
    %c0_i32_0 = arith.constant 0 : i32
    %c0_i32_1 = arith.constant 0 : i32
    return %c0_i32, %c0_i32_0 : i32, i32
  }
  func.func @transform_3(%arg0: i32) -> (i32, i32) {
    %c0_i32 = arith.constant 0 : i32
    %c0_i32_0 = arith.constant 0 : i32
    %c0_i32_1 = arith.constant 0 : i32
    return %c0_i32, %c0_i32_0 : i32, i32
  }
  func.func @transform_4(%arg0: i32) -> (i32, i32) {
    %c0_i32 = arith.constant 0 : i32
    %c0_i32_0 = arith.constant 0 : i32
    %c0_i32_1 = arith.constant 0 : i32
    return %c0_i32, %c0_i32_0 : i32, i32
  }
  func.func @transform_5(%arg0: i32) -> (i32, i32) {
    %c0_i32 = arith.constant 0 : i32
    %c0_i32_0 = arith.constant 0 : i32
    %c0_i32_1 = arith.constant 0 : i32
    return %c0_i32, %c0_i32_0 : i32, i32
  }
  func.func @transform_6(%arg0: i32) -> (i32, i32) {
    %c0_i32 = arith.constant 0 : i32
    %c0_i32_0 = arith.constant 0 : i32
    %c0_i32_1 = arith.constant 0 : i32
    return %c0_i32, %c0_i32_0 : i32, i32
  }
  func.func @transform_7(%arg0: i32) -> (i32, i32) {
    %c0_i32 = arith.constant 0 : i32
    %c0_i32_0 = arith.constant 0 : i32
    return %arg0, %c0_i32 : i32, i32
  }
}

</mosaic_0001>

<bundles_post_ra>
// kernel: net_forward.1
= control target key start
LH: loop header
LB: loop body
LE: loop exit
PB: predicated region body
PF: predicated region fallthrough
CT: control target
= control target key end

     0   :  { %vm27_vm0 = vcmask 523720   ;;  %v430_v0 = vmov 0.0   ;;  %vm431_vm1 = vmmov 0   ;;  %v432_v2 = vmov 0   ;;  %s566_s1 = inlined_call_operand.vmem [shape: bf16[64,128], index: 1, kind: input, shape index: {}]   ;;  %s567_s0 = inlined_call_operand.vmem [shape: f32[16,57], index: 0, kind: input, shape index: {}]   ;;  %s568_s3 = inlined_call_operand.vmem [shape: bf16[128,64], index: 3, kind: input, shape index: {}]   ;;  %s569_s5 = inlined_call_operand.vmem [shape: bf16[64,128], index: 5, kind: input, shape index: {}]   ;;  %s570_s2 = inlined_call_operand.vmem [shape: f32[1,128], index: 2, kind: input, shape index: {}]   ;;  %s571_s4 = inlined_call_operand.vmem [shape: f32[1,64], index: 4, kind: input, shape index: {}]   ;;  %s572_s6 = inlined_call_operand.vmem [shape: f32[1,128], index: 6, kind: input, shape index: {}]   ;;  %s573_s7 = inlined_call_operand.vmem [shape: f32[16,20], index: 7, kind: output, shape index: {}]  }
   0x1   :  { %367 = vmatprep.subr.bf16.mxu0 %v430_v0  ;;  %v414_v1 = vld [vmem:[%s566_s1] sm:$0xff]   ;;  %375 = vmatprep.mubr.msk.bf16.mxu0 %vm431_vm1, %v430_v0  ;;  %28 = vst.msk [vmem:[#allocation2] sm:$0xff] %vm27_vm0, %v432_v2  ;;  %v415_v3 = vld [vmem:[%s566_s1 + $0x8] sm:$0xff]   ;;  %vm32_vm2 = vcmask 465920   ;;  %v416_v8 = vld [vmem:[%s566_s1 + $0x10] sm:$0xff]   ;;  %vm74_vm3 = vcmask 523264  }
   0x2   :  { %379 = vmatprep.subr.bf16.mxu1 %v430_v0  ;;  %395 = vmatprep.mubr.msk.bf16.mxu1 %vm431_vm1, %v430_v0  ;;  %v29_v4 = vld [vmem:[%s567_s0] sm:$0xff]  ;;  %v30_v5 = vld [vmem:[%s567_s0 + $0x8] sm:$0xff]  ;;  %v417_v10 = vld [vmem:[%s566_s1 + $0x18] sm:$0xff]   ;;  %vm320_vm4 = vcmask 162816  }
   0x3   :  { %368 = vmatpush3.bf16.msra.mxu0 %v414_v1  ;;  %v31_v6 = vpack.c.bf16 %v30_v5, %v29_v4  ;;  %v418_v7 = vld [vmem:[%s568_s3] sm:$0xff]   ;;  %v419_v9 = vld [vmem:[%s568_s3 + $0x8] sm:$0xff]   ;;  %v420_v11 = vld [vmem:[%s568_s3 + $0x10] sm:$0xff]  }
   0x4   :  { %369 = vmatprep.subr.bf16.mxu0 %v430_v0  ;;  %380 = vmatpush3.bf16.msra.mxu1 %v418_v7  ;;  %v421_v13 = vld [vmem:[%s568_s3 + $0x18] sm:$0xff]   ;;  %v422_v14 = vld [vmem:[%s568_s3 + $0x20] sm:$0xff]   ;;  %v423_v15 = vld [vmem:[%s568_s3 + $0x28] sm:$0xff]  }
   0x5   :  { %33 = vst.msk [vmem:[#allocation2] sm:$0xff] %vm32_vm2, %v31_v6  ;;  %381 = vmatprep.subr.bf16.mxu1 %v430_v0  ;;  %v424_v16 = vld [vmem:[%s568_s3 + $0x30] sm:$0xff]   ;;  %v425_v17 = vld [vmem:[%s568_s3 + $0x38] sm:$0xff]   ;;  %v426_v18 = vld [vmem:[%s569_s5] sm:$0xff]  }
   0x6   :  { %v427_v19 = vld [vmem:[%s569_s5 + $0x8] sm:$0xff]   ;;  %v327_v20 = vld [vmem:[%s570_s2] ss:$0 sm:$0xff]  ;;  %v428_v30 = vld [vmem:[%s569_s5 + $0x10] sm:$0xff]  }
   0x7   :  { %370 = vmatpush3.bf16.msra.mxu0 %v415_v3  ;;  %v429_v31 = vld [vmem:[%s569_s5 + $0x18] sm:$0xff]   ;;  %v333_v32 = vld [vmem:[%s571_s4] ss:$0 sm:$0xff] }
   0x8   :  { %371 = vmatprep.subr.bf16.mxu0 %v430_v0  ;;  %382 = vmatpush3.bf16.msra.mxu1 %v419_v9  ;;  %v342_v42 = vld [vmem:[%s572_s6] ss:$0 sm:$0xff] }
   0x9   :  { %383 = vmatprep.subr.bf16.mxu1 %v430_v0 }
   0xb   :  { %372 = vmatpush3.bf16.msra.mxu0 %v416_v8 }
   0xc   :  { %373 = vmatprep.subr.bf16.mxu0 %v430_v0  ;;  %v34_v12 = vld [vmem:[#allocation2] sm:$0xff]  ;;  %384 = vmatpush3.bf16.msra.mxu1 %v420_v11 }
   0xd   :  { %385 = vmatprep.subr.bf16.mxu1 %v430_v0 }
   0xf   :  { %374 = vmatpush3.bf16.msra.mxu0 %v417_v10 }
  0x10   :  { %399 = vmatprep.subr.bf16.mxu0 %v430_v0  ;;  %386 = vmatpush3.bf16.msra.mxu1 %v421_v13 }
  0x11   :  { %387 = vmatprep.subr.bf16.mxu1 %v430_v0 }
  0x12   :  { %376 = vmatmul.mubr.msk.bf16.vlgmr.msra.gmra.mrb[0].mxu0 %vm74_vm3, %v34_v12 }
  0x13   :  { %407 = vmatprep.mubr.msk.bf16.mxu0 %vm431_vm1, %v430_v0  ;;  %400 = vmatpush3.bf16.msra.mxu0 %v426_v18 }
  0x14   :  { %388 = vmatpush3.bf16.msra.mxu1 %v422_v14  ;;  %401 = vmatprep.subr.bf16.mxu0 %v430_v0 }
  0x15   :  { %389 = vmatprep.subr.bf16.mxu1 %v430_v0 }
  0x17   :  { %402 = vmatpush3.bf16.msra.mxu0 %v427_v19 }
  0x18   :  { %390 = vmatpush3.bf16.msra.mxu1 %v423_v15  ;;  %403 = vmatprep.subr.bf16.mxu0 %v430_v0 }
  0x19   :  { %391 = vmatprep.subr.bf16.mxu1 %v430_v0 }
  0x1b   :  { %404 = vmatpush3.bf16.msra.mxu0 %v428_v30 }
  0x1c   :  { %392 = vmatpush3.bf16.msra.mxu1 %v424_v16  ;;  %405 = vmatprep.subr.bf16.mxu0 %v430_v0 }
  0x1d   :  { %393 = vmatprep.subr.bf16.mxu1 %v430_v0 }
  0x1f   :  { %406 = vmatpush3.bf16.msra.mxu0 %v429_v31 }
  0x20   :  { %394 = vmatpush3.bf16.msra.mxu1 %v425_v17 }
  0xe5   :  { %v112_v21 = vpop.f32.mrb[0].mxu0 }
  0xe6   :  { %v113_v22 = vadd.f32 %v327_v20, %v112_v21  ;;  %v377_v23 = vpop.f32.mrb[1].mxu0 }
  0xe7   :  { %v115_v24 = vpop.f32.mrb[2].mxu0 }
  0xe8   :  { %v116_v25 = vadd.f32 %v327_v20, %v115_v24  ;;  %v378_v26 = vpop.f32.mrb[3].mxu0  ;;  %v119_v27 = vmax.f32 %v113_v22, 0.0 }
  0xea   :  { %v120_v28 = vmax.f32 %v116_v25, 0.0 }
  0xec   :  { %v121_v29 = vpack.c.bf16 %v120_v28, %v119_v27 }
  0xee   :  { %396 = vmatmul.mubr.bf16.vlgmr.msra.gmra.mrb[0].mxu1 %v121_v29 }
 0x1c1   :  { %v227_v33 = vpop.f32.mrb[0].mxu1 }
 0x1c2   :  { %v228_v34 = vadd.f32 %v333_v32, %v227_v33  ;;  %v397_v35 = vpop.f32.mrb[1].mxu1 }
 0x1c3   :  { %v230_v36 = vpop.f32.mrb[2].mxu1 }
 0x1c4   :  { %v231_v37 = vadd.f32 %v333_v32, %v230_v36  ;;  %v398_v38 = vpop.f32.mrb[3].mxu1  ;;  %v234_v39 = vmax.f32 %v228_v34, 0.0 }
 0x1c6   :  { %v235_v40 = vmax.f32 %v231_v37, 0.0 }
 0x1c8   :  { %v236_v41 = vpack.c.bf16 %v235_v40, %v234_v39 }
 0x1ca   :  { %408 = vmatmul.mubr.msk.bf16.vlgmr.msra.gmra.mrb[4].mxu0 %vm74_vm3, %v236_v41 }
 0x29d   :  { %v313_v43 = vpop.f32.mrb[4].mxu0 }
 0x29e   :  { %v314_v44 = vadd.f32 %v342_v42, %v313_v43  ;;  %v409_v45 = vpop.f32.mrb[5].mxu0 }
 0x29f   :  { %v316_v46 = vpop.f32.mrb[6].mxu0 }
 0x2a0   :  { %321 = vst.msk [vmem:[%s573_s7] sm:$0xff] %vm320_vm4, %v314_v44  ;;  %v317_v47 = vadd.f32 %v342_v42, %v316_v46  ;;  %v410_v48 = vpop.f32.mrb[7].mxu0 }
 0x2a2   :  { %322 = vst.msk [vmem:[%s573_s7 + $0x8] sm:$0xff] %vm320_vm4, %v317_v47 }

</bundles_post_ra>
